<compile_context>
chip_gen: v5e
topology: v5e:2x2
jax: 0.10.0
libtpu: 0.0.40
codegen_flags: <defaults>
</compile_context>

<pallas_src>
import jax
import jax.numpy as jnp
from jax.experimental import pallas as pl
from jax.experimental.pallas import tpu as pltpu


def _round_up(n, m):
    return ((n + m - 1) // m) * m


# ---------------------------------------------------------------------------
# Fused kernel: conv+BN(eval,folded)+ReLU+maxpool + all MLP heads
# ---------------------------------------------------------------------------
def mtcnn_fused_kernel(x_ref, wconv_ref, shift_ref,
                       w1_ref, b1_ref, w2_ref, b2_ref, w3_ref, b3_ref,
                       o_ref):
    # x_ref:     (Bt, L)           squeezed input signal tile
    # wconv_ref: (3, C)            conv taps with BN scale folded in
    # shift_ref: (1, C)            folded BN shift (absorbs conv bias)
    # w1_ref:    (L2, C, 128*H)    layer-1 weights, re-ordered to channel-major flatten
    # b1_ref:    (1, 128*H)
    # w2_ref:    (128*H, 64*H)     block-diagonal per-head layer-2 weights
    # b2_ref:    (1, 64*H)
    # w3_ref:    (64*H, NOp)       block-structured layer-3 weights, lane-padded
    # b3_ref:    (1, NOp)
    # o_ref:     (Bt, NOp)         lane-padded concatenated head outputs
    x = x_ref[...]
    B, L = x.shape
    C = wconv_ref.shape[1]
    L2, _, N1 = w1_ref.shape

    # zero-pad once (single small concat), then take static shifted slices
    zcol = jnp.zeros((B, 1), x.dtype)
    xp = jnp.concatenate([zcol, x, zcol], axis=1)            # (B, L+2)

    w = wconv_ref[...]                                        # (3, C), BN-scale folded
    w_l = w[0:1, :].reshape(1, 1, C)
    w_c = w[1:2, :].reshape(1, 1, C)
    w_r = w[2:3, :].reshape(1, 1, C)

    # accumulate taps into a single (B, L, C) buffer (fewer live temporaries)
    acc = x[:, :, None] * w_c
    acc = acc + xp[:, 0:L, None] * w_l
    acc = acc + xp[:, 2:L + 2, None] * w_r

    y = jnp.maximum(acc + shift_ref[...].reshape(1, 1, C), 0.0)   # BN shift + ReLU

    # MaxPool1d(2) fused with the layer-1 matmul: never materialize (B, F) feats.
    # w1_ref[l][c, :] corresponds to PyTorch feature index c*L2 + l, so the sum
    # over l reproduces feats @ W1cat exactly.
    h1 = jnp.zeros((B, N1), jnp.float32)
    for l in range(L2):                                       # static, unrolled (floor pool)
        p = jnp.maximum(y[:, 2 * l, :], y[:, 2 * l + 1, :])   # (B, C)
        h1 = h1 + jnp.dot(p, w1_ref[l], preferred_element_type=jnp.float32)
    h1 = jnp.maximum(h1 + b1_ref[...], 0.0)

    h2 = jnp.maximum(
        jnp.dot(h1, w2_ref[...], preferred_element_type=jnp.float32) + b2_ref[...], 0.0)
    o_ref[...] = (jnp.dot(h2, w3_ref[...], preferred_element_type=jnp.float32)
                  + b3_ref[...])


# ---------------------------------------------------------------------------
# Wrapper: single pallas_call over an (optional) batch grid
# ---------------------------------------------------------------------------
def mtcnn_fused(x2d, fp):
    B, L = x2d.shape
    L2, C, N1 = fp["w1"].shape
    N2 = fp["w2"].shape[1]
    NOp = fp["w3"].shape[1]          # lane-padded (multiple of 128)

    # batch tile: full batch at toy size; 8-row tiles (sublane aligned) when it grows
    block_b = 8 if (B > 8 and B % 8 == 0) else B
    nb = B // block_b

    flops = 2 * B * L * C * 3 + 2 * B * (L2 * C * N1 + N1 * N2 + N2 * NOp)
    bytes_accessed = 4 * (B * L + 3 * C + C + L2 * C * N1 + N1
                          + N1 * N2 + N2 + N2 * NOp + NOp + B * NOp)
    cost = pl.CostEstimate(flops=flops, transcendentals=0,
                           bytes_accessed=bytes_accessed)

    in_specs = [
        pl.BlockSpec((block_b, L), lambda i: (i, 0)),
        pl.BlockSpec((3, C), lambda i: (0, 0)),
        pl.BlockSpec((1, C), lambda i: (0, 0)),
        pl.BlockSpec((L2, C, N1), lambda i: (0, 0, 0)),
        pl.BlockSpec((1, N1), lambda i: (0, 0)),
        pl.BlockSpec((N1, N2), lambda i: (0, 0)),
        pl.BlockSpec((1, N2), lambda i: (0, 0)),
        pl.BlockSpec((N2, NOp), lambda i: (0, 0)),
        pl.BlockSpec((1, NOp), lambda i: (0, 0)),
    ]
    return pl.pallas_call(
        mtcnn_fused_kernel,
        out_shape=jax.ShapeDtypeStruct((B, NOp), jnp.float32),
        grid=(nb,),
        in_specs=in_specs,
        out_specs=pl.BlockSpec((block_b, NOp), lambda i: (i, 0)),
        compiler_params=pltpu.CompilerParams(dimension_semantics=("parallel",)),
        cost_estimate=cost,
    )(x2d, fp["wconv"], fp["shift"], fp["w1"], fp["b1"],
      fp["w2"], fp["b2"], fp["w3"], fp["b3"])


def mtcnn_forward(x, params, output_dims):
    # x: (B, 1, L) — PyTorch NCL input with in_channels=1
    folded = fold_params(params)
    out = mtcnn_fused(x[:, 0, :], folded)        # (B, NO_padded)
    outs, off = [], 0
    for d in output_dims:
        outs.append(out[:, off:off + d])
        off += d
    return outs


# ---------------------------------------------------------------------------
# Parameter init (PyTorch-style synthetic weights) + fold for the kernel
# ---------------------------------------------------------------------------
def init_params(key, input_dim, output_dims):
    C = 64
    L2 = input_dim // 2
    F = C * L2  # total_features from the PyTorch dummy-input probe (computed analytically)
    n_head_keys = 6 * len(output_dims)
    keys = jax.random.split(key, 4 + n_head_keys)

    conv_w = jax.random.normal(keys[0], (3, C), jnp.float32) * 0.1   # taps x out-channel
    conv_b = jax.random.normal(keys[1], (C,), jnp.float32) * 0.1
    gamma = jax.random.uniform(keys[2], (C,), jnp.float32, minval=0.5, maxval=1.5)
    beta = jax.random.normal(keys[3], (C,), jnp.float32) * 0.1
    running_mean = jnp.zeros((C,), jnp.float32)
    running_var = jnp.ones((C,), jnp.float32)

    heads = []
    ki = 4
    for out_dim in output_dims:
        head = []
        for (din, dout) in [(F, 128), (128, 64), (64, out_dim)]:
            w = jax.random.normal(keys[ki], (din, dout), jnp.float32) / jnp.sqrt(din)
            ki += 1
            b = jax.random.normal(keys[ki], (1, dout), jnp.float32) * 0.01
            ki += 1
            head.extend([w, b])
        heads.append(tuple(head))

    return dict(conv_w=conv_w, conv_b=conv_b, gamma=gamma, beta=beta,
                mean=running_mean, var=running_var, eps=1e-5, heads=heads)


def _block_diag(mats):
    rows = sum(m.shape[0] for m in mats)
    cols = sum(m.shape[1] for m in mats)
    out = jnp.zeros((rows, cols), mats[0].dtype)
    r = c = 0
    for m in mats:
        out = out.at[r:r + m.shape[0], c:c + m.shape[1]].set(m)
        r += m.shape[0]
        c += m.shape[1]
    return out


def fold_params(params):
    # TODO(synk): BatchNorm training-mode (batch-statistics) path not implemented;
    # eval-mode affine BN is folded into the conv taps / shift.
    C = params["conv_w"].shape[1]
    scale = params["gamma"] / jnp.sqrt(params["var"] + params["eps"])       # (C,)
    wconv = params["conv_w"] * scale[None, :]                               # (3, C)
    shift = (params["beta"] + (params["conv_b"] - params["mean"]) * scale).reshape(1, C)

    heads = params["heads"]
    F = heads[0][0].shape[0]
    L2 = F // C
    # layer 1: re-order rows from PyTorch's channel-major flatten (c*L2 + l) to
    # (L2, C, 128) and concatenate heads along the output axis -> (L2, C, 128*H)
    w1 = jnp.concatenate(
        [h[0].reshape(C, L2, h[0].shape[1]).transpose(1, 0, 2) for h in heads], axis=-1)
    b1 = jnp.concatenate([h[1] for h in heads], axis=-1)                    # (1, 128H)
    w2 = _block_diag([h[2] for h in heads])                                 # (128H, 64H)
    b2 = jnp.concatenate([h[3] for h in heads], axis=-1)                    # (1, 64H)
    w3 = _block_diag([h[4] for h in heads])                                 # (64H, NO)
    b3 = jnp.concatenate([h[5] for h in heads], axis=-1)                    # (1, NO)

    # lane-pad the final output axis to a multiple of 128 so the kernel's output
    # store is an unmasked full-lane vst (padded columns are exactly zero and are
    # sliced off in the wrapper).
    NO = w3.shape[1]
    NOp = _round_up(NO, 128)
    if NOp != NO:
        w3 = jnp.pad(w3, ((0, 0), (0, NOp - NO)))
        b3 = jnp.pad(b3, ((0, 0), (0, NOp - NO)))
    return dict(wconv=wconv, shift=shift, w1=w1, b1=b1, w2=w2, b2=b2, w3=w3, b3=b3)


# ---------------------------------------------------------------------------
# Pure-JAX reference (PyTorch semantics, unfolded params) for verification
# ---------------------------------------------------------------------------
def reference_forward(x, params):
    x2d = x[:, 0, :]
    B, L = x2d.shape
    C = params["conv_w"].shape[1]
    L2 = L // 2
    xp = jnp.pad(x2d, ((0, 0), (1, 1)))
    w = params["conv_w"]
    conv = (xp[:, 0:L, None] * w[0] + xp[:, 1:L + 1, None] * w[1]
            + xp[:, 2:L + 2, None] * w[2]) + params["conv_b"]               # (B, L, C)
    scale = params["gamma"] / jnp.sqrt(params["var"] + params["eps"])
    y = jnp.maximum((conv - params["mean"]) * scale + params["beta"], 0.0)
    pooled = y[:, :2 * L2, :].reshape(B, L2, 2, C).max(axis=2)              # (B, L2, C)
    feats = jnp.transpose(pooled, (0, 2, 1)).reshape(B, -1)                 # torch view(B,-1)
    outs = []
    for (w1, b1, w2, b2, w3, b3) in params["heads"]:
        h = jnp.maximum(feats @ w1 + b1, 0.0)
        h = jnp.maximum(h @ w2 + b2, 0.0)
        outs.append(h @ w3 + b3)
    return outs


if __name__ == "__main__":
    key = jax.random.PRNGKey(0)
    input_dim = 16            # "input_dim" of the PyTorch module (L)
    output_dims = [3, 5]      # two task heads
    B = 2

    pkey, xkey = jax.random.split(key)
    params = init_params(pkey, input_dim, output_dims)
    x = jax.random.normal(xkey, (B, 1, input_dim), jnp.float32)

    outs = mtcnn_forward(x, params, output_dims)
    outs = [jax.block_until_ready(o) for o in outs]

    refs = reference_forward(x, params)
    for o, r, d in zip(outs, refs, output_dims):
        assert o.shape == (B, d), (o.shape, (B, d))
        assert jnp.allclose(o, r, rtol=1e-3, atol=1e-4), "mismatch vs reference"

    print("KERNEL_OK")
</pallas_src>

<mosaic_0001>
module attributes {stable_mosaic.version = 11 : i64} {
  func.func @mtcnn_fused_kernel(%arg0: i32, %arg1: memref<2x16xf32, #tpu.memory_space<vmem>>, %arg2: memref<3x64xf32, #tpu.memory_space<vmem>>, %arg3: memref<1x64xf32, #tpu.memory_space<vmem>>, %arg4: memref<8x64x256xf32, #tpu.memory_space<vmem>>, %arg5: memref<1x256xf32, #tpu.memory_space<vmem>>, %arg6: memref<256x128xf32, #tpu.memory_space<vmem>>, %arg7: memref<1x128xf32, #tpu.memory_space<vmem>>, %arg8: memref<128x128xf32, #tpu.memory_space<vmem>>, %arg9: memref<1x128xf32, #tpu.memory_space<vmem>>, %arg10: memref<2x128xf32, #tpu.memory_space<vmem>>) attributes {dimension_semantics = [#tpu.dimension_semantics<parallel>], iteration_bounds = array<i64: 1>, scalar_prefetch = 0 : i64, scratch_operands = 0 : i64, tpu.core_type = #tpu.core_type<tc>, window_params = [{transform_indices = @transform_0, window_bounds = array<i64: 2, 16>}, {pipeline_mode = #tpu.pipeline_mode<synchronous>, transform_indices = @transform_1, window_bounds = array<i64: 3, 64>}, {pipeline_mode = #tpu.pipeline_mode<synchronous>, transform_indices = @transform_2, window_bounds = array<i64: 1, 64>}, {pipeline_mode = #tpu.pipeline_mode<synchronous>, transform_indices = @transform_3, window_bounds = array<i64: 8, 64, 256>}, {pipeline_mode = #tpu.pipeline_mode<synchronous>, transform_indices = @transform_4, window_bounds = array<i64: 1, 256>}, {pipeline_mode = #tpu.pipeline_mode<synchronous>, transform_indices = @transform_5, window_bounds = array<i64: 256, 128>}, {pipeline_mode = #tpu.pipeline_mode<synchronous>, transform_indices = @transform_6, window_bounds = array<i64: 1, 128>}, {pipeline_mode = #tpu.pipeline_mode<synchronous>, transform_indices = @transform_7, window_bounds = array<i64: 128, 128>}, {pipeline_mode = #tpu.pipeline_mode<synchronous>, transform_indices = @transform_8, window_bounds = array<i64: 1, 128>}, {transform_indices = @transform_9, window_bounds = array<i64: 2, 128>}]} {
    %c0 = arith.constant 0 : index
    %c0_0 = arith.constant 0 : index
    %0 = vector.load %arg1[%c0, %c0_0] : memref<2x16xf32, #tpu.memory_space<vmem>>, vector<2x16xf32>
    %cst = arith.constant 0.000000e+00 : f32
    %1 = vector.broadcast %cst : f32 to vector<2x1xf32>
    %2 = tpu.concatenate %1, %0, %1 in 1 : vector<2x1xf32>, vector<2x16xf32>, vector<2x1xf32> -> vector<2x18xf32>
    %c0_1 = arith.constant 0 : index
    %c0_2 = arith.constant 0 : index
    %3 = vector.load %arg2[%c0_1, %c0_2] : memref<3x64xf32, #tpu.memory_space<vmem>>, vector<3x64xf32>
    %4 = vector.extract_strided_slice %3 {offsets = [0, 0], sizes = [1, 64], strides = [1, 1]} : vector<3x64xf32> to vector<1x64xf32>
    %5 = vector.shape_cast %4 : vector<1x64xf32> to vector<1x1x64xf32>
    %6 = vector.extract_strided_slice %3 {offsets = [1, 0], sizes = [1, 64], strides = [1, 1]} : vector<3x64xf32> to vector<1x64xf32>
    %7 = vector.shape_cast %6 : vector<1x64xf32> to vector<1x1x64xf32>
    %8 = vector.extract_strided_slice %3 {offsets = [2, 0], sizes = [1, 64], strides = [1, 1]} : vector<3x64xf32> to vector<1x64xf32>
    %9 = vector.shape_cast %8 : vector<1x64xf32> to vector<1x1x64xf32>
    %10 = vector.shape_cast %0 : vector<2x16xf32> to vector<2x16x1xf32>
    %11 = vector.broadcast %10 : vector<2x16x1xf32> to vector<2x16x64xf32>
    %12 = vector.broadcast %7 : vector<1x1x64xf32> to vector<2x16x64xf32>
    %13 = arith.mulf %11, %12 : vector<2x16x64xf32>
    %14 = vector.extract_strided_slice %2 {offsets = [0, 0], sizes = [2, 16], strides = [1, 1]} : vector<2x18xf32> to vector<2x16xf32>
    %15 = vector.shape_cast %14 : vector<2x16xf32> to vector<2x16x1xf32>
    %16 = vector.broadcast %15 : vector<2x16x1xf32> to vector<2x16x64xf32>
    %17 = vector.broadcast %5 : vector<1x1x64xf32> to vector<2x16x64xf32>
    %18 = arith.mulf %16, %17 : vector<2x16x64xf32>
    %19 = arith.addf %13, %18 : vector<2x16x64xf32>
    %20 = vector.extract_strided_slice %2 {offsets = [0, 2], sizes = [2, 16], strides = [1, 1]} : vector<2x18xf32> to vector<2x16xf32>
    %21 = vector.shape_cast %20 : vector<2x16xf32> to vector<2x16x1xf32>
    %22 = vector.broadcast %21 : vector<2x16x1xf32> to vector<2x16x64xf32>
    %23 = vector.broadcast %9 : vector<1x1x64xf32> to vector<2x16x64xf32>
    %24 = arith.mulf %22, %23 : vector<2x16x64xf32>
    %25 = arith.addf %19, %24 : vector<2x16x64xf32>
    %c0_3 = arith.constant 0 : index
    %c0_4 = arith.constant 0 : index
    %26 = vector.load %arg3[%c0_3, %c0_4] : memref<1x64xf32, #tpu.memory_space<vmem>>, vector<1x64xf32>
    %27 = vector.shape_cast %26 : vector<1x64xf32> to vector<1x1x64xf32>
    %28 = vector.broadcast %27 : vector<1x1x64xf32> to vector<2x16x64xf32>
    %29 = arith.addf %25, %28 : vector<2x16x64xf32>
    %cst_5 = arith.constant 0.000000e+00 : f32
    %30 = vector.broadcast %cst_5 : f32 to vector<2x16x64xf32>
    %31 = arith.maximumf %29, %30 : vector<2x16x64xf32>
    %cst_6 = arith.constant 0.000000e+00 : f32
    %32 = vector.broadcast %cst_6 : f32 to vector<2x256xf32>
    %33 = vector.extract_strided_slice %31 {offsets = [0, 0, 0], sizes = [2, 1, 64], strides = [1, 1, 1]} : vector<2x16x64xf32> to vector<2x1x64xf32>
    %34 = vector.shape_cast %33 : vector<2x1x64xf32> to vector<2x64xf32>
    %35 = vector.extract_strided_slice %31 {offsets = [0, 1, 0], sizes = [2, 1, 64], strides = [1, 1, 1]} : vector<2x16x64xf32> to vector<2x1x64xf32>
    %36 = vector.shape_cast %35 : vector<2x1x64xf32> to vector<2x64xf32>
    %37 = arith.maximumf %34, %36 : vector<2x64xf32>
    %c0_7 = arith.constant 0 : index
    %c0_8 = arith.constant 0 : index
    %c0_9 = arith.constant 0 : index
    %38 = vector.load %arg4[%c0_7, %c0_8, %c0_9] : memref<8x64x256xf32, #tpu.memory_space<vmem>>, vector<1x64x256xf32>
    %39 = vector.shape_cast %38 : vector<1x64x256xf32> to vector<64x256xf32>
    %cst_10 = arith.constant dense<0.000000e+00> : vector<2x256xf32>
    %40 = tpu.matmul %37, %39, %cst_10 {dimension_numbers = #tpu.dot_dimension_numbers<[1], [0], [0], [1], [0, 0, 1, 1], [], []>} : vector<2x64xf32>, vector<64x256xf32>, vector<2x256xf32> -> vector<2x256xf32>
    %41 = arith.addf %32, %40 : vector<2x256xf32>
    %42 = vector.extract_strided_slice %31 {offsets = [0, 2, 0], sizes = [2, 1, 64], strides = [1, 1, 1]} : vector<2x16x64xf32> to vector<2x1x64xf32>
    %43 = vector.shape_cast %42 : vector<2x1x64xf32> to vector<2x64xf32>
    %44 = vector.extract_strided_slice %31 {offsets = [0, 3, 0], sizes = [2, 1, 64], strides = [1, 1, 1]} : vector<2x16x64xf32> to vector<2x1x64xf32>
    %45 = vector.shape_cast %44 : vector<2x1x64xf32> to vector<2x64xf32>
    %46 = arith.maximumf %43, %45 : vector<2x64xf32>
    %c1 = arith.constant 1 : index
    %c0_11 = arith.constant 0 : index
    %c0_12 = arith.constant 0 : index
    %47 = vector.load %arg4[%c1, %c0_11, %c0_12] : memref<8x64x256xf32, #tpu.memory_space<vmem>>, vector<1x64x256xf32>
    %48 = vector.shape_cast %47 : vector<1x64x256xf32> to vector<64x256xf32>
    %cst_13 = arith.constant dense<0.000000e+00> : vector<2x256xf32>
    %49 = tpu.matmul %46, %48, %cst_13 {dimension_numbers = #tpu.dot_dimension_numbers<[1], [0], [0], [1], [0, 0, 1, 1], [], []>} : vector<2x64xf32>, vector<64x256xf32>, vector<2x256xf32> -> vector<2x256xf32>
    %50 = arith.addf %41, %49 : vector<2x256xf32>
    %51 = vector.extract_strided_slice %31 {offsets = [0, 4, 0], sizes = [2, 1, 64], strides = [1, 1, 1]} : vector<2x16x64xf32> to vector<2x1x64xf32>
    %52 = vector.shape_cast %51 : vector<2x1x64xf32> to vector<2x64xf32>
    %53 = vector.extract_strided_slice %31 {offsets = [0, 5, 0], sizes = [2, 1, 64], strides = [1, 1, 1]} : vector<2x16x64xf32> to vector<2x1x64xf32>
    %54 = vector.shape_cast %53 : vector<2x1x64xf32> to vector<2x64xf32>
    %55 = arith.maximumf %52, %54 : vector<2x64xf32>
    %c2 = arith.constant 2 : index
    %c0_14 = arith.constant 0 : index
    %c0_15 = arith.constant 0 : index
    %56 = vector.load %arg4[%c2, %c0_14, %c0_15] : memref<8x64x256xf32, #tpu.memory_space<vmem>>, vector<1x64x256xf32>
    %57 = vector.shape_cast %56 : vector<1x64x256xf32> to vector<64x256xf32>
    %cst_16 = arith.constant dense<0.000000e+00> : vector<2x256xf32>
    %58 = tpu.matmul %55, %57, %cst_16 {dimension_numbers = #tpu.dot_dimension_numbers<[1], [0], [0], [1], [0, 0, 1, 1], [], []>} : vector<2x64xf32>, vector<64x256xf32>, vector<2x256xf32> -> vector<2x256xf32>
    %59 = arith.addf %50, %58 : vector<2x256xf32>
    %60 = vector.extract_strided_slice %31 {offsets = [0, 6, 0], sizes = [2, 1, 64], strides = [1, 1, 1]} : vector<2x16x64xf32> to vector<2x1x64xf32>
    %61 = vector.shape_cast %60 : vector<2x1x64xf32> to vector<2x64xf32>
    %62 = vector.extract_strided_slice %31 {offsets = [0, 7, 0], sizes = [2, 1, 64], strides = [1, 1, 1]} : vector<2x16x64xf32> to vector<2x1x64xf32>
    %63 = vector.shape_cast %62 : vector<2x1x64xf32> to vector<2x64xf32>
    %64 = arith.maximumf %61, %63 : vector<2x64xf32>
    %c3 = arith.constant 3 : index
    %c0_17 = arith.constant 0 : index
    %c0_18 = arith.constant 0 : index
    %65 = vector.load %arg4[%c3, %c0_17, %c0_18] : memref<8x64x256xf32, #tpu.memory_space<vmem>>, vector<1x64x256xf32>
    %66 = vector.shape_cast %65 : vector<1x64x256xf32> to vector<64x256xf32>
    %cst_19 = arith.constant dense<0.000000e+00> : vector<2x256xf32>
    %67 = tpu.matmul %64, %66, %cst_19 {dimension_numbers = #tpu.dot_dimension_numbers<[1], [0], [0], [1], [0, 0, 1, 1], [], []>} : vector<2x64xf32>, vector<64x256xf32>, vector<2x256xf32> -> vector<2x256xf32>
    %68 = arith.addf %59, %67 : vector<2x256xf32>
    %69 = vector.extract_strided_slice %31 {offsets = [0, 8, 0], sizes = [2, 1, 64], strides = [1, 1, 1]} : vector<2x16x64xf32> to vector<2x1x64xf32>
    %70 = vector.shape_cast %69 : vector<2x1x64xf32> to vector<2x64xf32>
    %71 = vector.extract_strided_slice %31 {offsets = [0, 9, 0], sizes = [2, 1, 64], strides = [1, 1, 1]} : vector<2x16x64xf32> to vector<2x1x64xf32>
    %72 = vector.shape_cast %71 : vector<2x1x64xf32> to vector<2x64xf32>
    %73 = arith.maximumf %70, %72 : vector<2x64xf32>
    %c4 = arith.constant 4 : index
    %c0_20 = arith.constant 0 : index
    %c0_21 = arith.constant 0 : index
    %74 = vector.load %arg4[%c4, %c0_20, %c0_21] : memref<8x64x256xf32, #tpu.memory_space<vmem>>, vector<1x64x256xf32>
    %75 = vector.shape_cast %74 : vector<1x64x256xf32> to vector<64x256xf32>
    %cst_22 = arith.constant dense<0.000000e+00> : vector<2x256xf32>
    %76 = tpu.matmul %73, %75, %cst_22 {dimension_numbers = #tpu.dot_dimension_numbers<[1], [0], [0], [1], [0, 0, 1, 1], [], []>} : vector<2x64xf32>, vector<64x256xf32>, vector<2x256xf32> -> vector<2x256xf32>
    %77 = arith.addf %68, %76 : vector<2x256xf32>
    %78 = vector.extract_strided_slice %31 {offsets = [0, 10, 0], sizes = [2, 1, 64], strides = [1, 1, 1]} : vector<2x16x64xf32> to vector<2x1x64xf32>
    %79 = vector.shape_cast %78 : vector<2x1x64xf32> to vector<2x64xf32>
    %80 = vector.extract_strided_slice %31 {offsets = [0, 11, 0], sizes = [2, 1, 64], strides = [1, 1, 1]} : vector<2x16x64xf32> to vector<2x1x64xf32>
    %81 = vector.shape_cast %80 : vector<2x1x64xf32> to vector<2x64xf32>
    %82 = arith.maximumf %79, %81 : vector<2x64xf32>
    %c5 = arith.constant 5 : index
    %c0_23 = arith.constant 0 : index
    %c0_24 = arith.constant 0 : index
    %83 = vector.load %arg4[%c5, %c0_23, %c0_24] : memref<8x64x256xf32, #tpu.memory_space<vmem>>, vector<1x64x256xf32>
    %84 = vector.shape_cast %83 : vector<1x64x256xf32> to vector<64x256xf32>
    %cst_25 = arith.constant dense<0.000000e+00> : vector<2x256xf32>
    %85 = tpu.matmul %82, %84, %cst_25 {dimension_numbers = #tpu.dot_dimension_numbers<[1], [0], [0], [1], [0, 0, 1, 1], [], []>} : vector<2x64xf32>, vector<64x256xf32>, vector<2x256xf32> -> vector<2x256xf32>
    %86 = arith.addf %77, %85 : vector<2x256xf32>
    %87 = vector.extract_strided_slice %31 {offsets = [0, 12, 0], sizes = [2, 1, 64], strides = [1, 1, 1]} : vector<2x16x64xf32> to vector<2x1x64xf32>
    %88 = vector.shape_cast %87 : vector<2x1x64xf32> to vector<2x64xf32>
    %89 = vector.extract_strided_slice %31 {offsets = [0, 13, 0], sizes = [2, 1, 64], strides = [1, 1, 1]} : vector<2x16x64xf32> to vector<2x1x64xf32>
    %90 = vector.shape_cast %89 : vector<2x1x64xf32> to vector<2x64xf32>
    %91 = arith.maximumf %88, %90 : vector<2x64xf32>
    %c6 = arith.constant 6 : index
    %c0_26 = arith.constant 0 : index
    %c0_27 = arith.constant 0 : index
    %92 = vector.load %arg4[%c6, %c0_26, %c0_27] : memref<8x64x256xf32, #tpu.memory_space<vmem>>, vector<1x64x256xf32>
    %93 = vector.shape_cast %92 : vector<1x64x256xf32> to vector<64x256xf32>
    %cst_28 = arith.constant dense<0.000000e+00> : vector<2x256xf32>
    %94 = tpu.matmul %91, %93, %cst_28 {dimension_numbers = #tpu.dot_dimension_numbers<[1], [0], [0], [1], [0, 0, 1, 1], [], []>} : vector<2x64xf32>, vector<64x256xf32>, vector<2x256xf32> -> vector<2x256xf32>
    %95 = arith.addf %86, %94 : vector<2x256xf32>
    %96 = vector.extract_strided_slice %31 {offsets = [0, 14, 0], sizes = [2, 1, 64], strides = [1, 1, 1]} : vector<2x16x64xf32> to vector<2x1x64xf32>
    %97 = vector.shape_cast %96 : vector<2x1x64xf32> to vector<2x64xf32>
    %98 = vector.extract_strided_slice %31 {offsets = [0, 15, 0], sizes = [2, 1, 64], strides = [1, 1, 1]} : vector<2x16x64xf32> to vector<2x1x64xf32>
    %99 = vector.shape_cast %98 : vector<2x1x64xf32> to vector<2x64xf32>
    %100 = arith.maximumf %97, %99 : vector<2x64xf32>
    %c7 = arith.constant 7 : index
    %c0_29 = arith.constant 0 : index
    %c0_30 = arith.constant 0 : index
    %101 = vector.load %arg4[%c7, %c0_29, %c0_30] : memref<8x64x256xf32, #tpu.memory_space<vmem>>, vector<1x64x256xf32>
    %102 = vector.shape_cast %101 : vector<1x64x256xf32> to vector<64x256xf32>
    %cst_31 = arith.constant dense<0.000000e+00> : vector<2x256xf32>
    %103 = tpu.matmul %100, %102, %cst_31 {dimension_numbers = #tpu.dot_dimension_numbers<[1], [0], [0], [1], [0, 0, 1, 1], [], []>} : vector<2x64xf32>, vector<64x256xf32>, vector<2x256xf32> -> vector<2x256xf32>
    %104 = arith.addf %95, %103 : vector<2x256xf32>
    %c0_32 = arith.constant 0 : index
    %c0_33 = arith.constant 0 : index
    %105 = vector.load %arg5[%c0_32, %c0_33] : memref<1x256xf32, #tpu.memory_space<vmem>>, vector<1x256xf32>
    %106 = vector.broadcast %105 : vector<1x256xf32> to vector<2x256xf32>
    %107 = arith.addf %104, %106 : vector<2x256xf32>
    %cst_34 = arith.constant 0.000000e+00 : f32
    %108 = vector.broadcast %cst_34 : f32 to vector<2x256xf32>
    %109 = arith.maximumf %107, %108 : vector<2x256xf32>
    %c0_35 = arith.constant 0 : index
    %c0_36 = arith.constant 0 : index
    %110 = vector.load %arg6[%c0_35, %c0_36] : memref<256x128xf32, #tpu.memory_space<vmem>>, vector<256x128xf32>
    %cst_37 = arith.constant dense<0.000000e+00> : vector<2x128xf32>
    %111 = tpu.matmul %109, %110, %cst_37 {dimension_numbers = #tpu.dot_dimension_numbers<[1], [0], [0], [1], [0, 0, 1, 1], [], []>} : vector<2x256xf32>, vector<256x128xf32>, vector<2x128xf32> -> vector<2x128xf32>
    %c0_38 = arith.constant 0 : index
    %c0_39 = arith.constant 0 : index
    %112 = vector.load %arg7[%c0_38, %c0_39] : memref<1x128xf32, #tpu.memory_space<vmem>>, vector<1x128xf32>
    %113 = vector.broadcast %112 : vector<1x128xf32> to vector<2x128xf32>
    %114 = arith.addf %111, %113 : vector<2x128xf32>
    %cst_40 = arith.constant 0.000000e+00 : f32
    %115 = vector.broadcast %cst_40 : f32 to vector<2x128xf32>
    %116 = arith.maximumf %114, %115 : vector<2x128xf32>
    %c0_41 = arith.constant 0 : index
    %c0_42 = arith.constant 0 : index
    %117 = vector.load %arg8[%c0_41, %c0_42] : memref<128x128xf32, #tpu.memory_space<vmem>>, vector<128x128xf32>
    %cst_43 = arith.constant dense<0.000000e+00> : vector<2x128xf32>
    %118 = tpu.matmul %116, %117, %cst_43 {dimension_numbers = #tpu.dot_dimension_numbers<[1], [0], [0], [1], [0, 0, 1, 1], [], []>} : vector<2x128xf32>, vector<128x128xf32>, vector<2x128xf32> -> vector<2x128xf32>
    %c0_44 = arith.constant 0 : index
    %c0_45 = arith.constant 0 : index
    %119 = vector.load %arg9[%c0_44, %c0_45] : memref<1x128xf32, #tpu.memory_space<vmem>>, vector<1x128xf32>
    %120 = vector.broadcast %119 : vector<1x128xf32> to vector<2x128xf32>
    %121 = arith.addf %118, %120 : vector<2x128xf32>
    %c0_46 = arith.constant 0 : index
    %c0_47 = arith.constant 0 : index
    %122 = vector.load %arg10[%c0_46, %c0_47] : memref<2x128xf32, #tpu.memory_space<vmem>>, vector<2x128xf32>
    tpu.vector_store %arg10[%c0_46, %c0_47], %121 {strides = array<i32>} : memref<2x128xf32, #tpu.memory_space<vmem>>, vector<2x128xf32>,
    return
  }
  func.func @transform_0(%arg0: i32) -> (i32, i32) {
    %c0_i32 = arith.constant 0 : i32
    %c0_i32_0 = arith.constant 0 : i32
    return %arg0, %c0_i32 : i32, i32
  }
  func.func @transform_1(%arg0: i32) -> (i32, i32) {
    %c0_i32 = arith.constant 0 : i32
    %c0_i32_0 = arith.constant 0 : i32
    %c0_i32_1 = arith.constant 0 : i32
    return %c0_i32, %c0_i32_0 : i32, i32
  }
  func.func @transform_2(%arg0: i32) -> (i32, i32) {
    %c0_i32 = arith.constant 0 : i32
    %c0_i32_0 = arith.constant 0 : i32
    %c0_i32_1 = arith.constant 0 : i32
    return %c0_i32, %c0_i32_0 : i32, i32
  }
  func.func @transform_3(%arg0: i32) -> (i32, i32, i32) {
    %c0_i32 = arith.constant 0 : i32
    %c0_i32_0 = arith.constant 0 : i32
    %c0_i32_1 = arith.constant 0 : i32
    %c0_i32_2 = arith.constant 0 : i32
    return %c0_i32, %c0_i32_0, %c0_i32_1 : i32, i32, i32
  }
  func.func @transform_4(%arg0: i32) -> (i32, i32) {
    %c0_i32 = arith.constant 0 : i32
    %c0_i32_0 = arith.constant 0 : i32
    %c0_i32_1 = arith.constant 0 : i32
    return %c0_i32, %c0_i32_0 : i32, i32
  }
  func.func @transform_5(%arg0: i32) -> (i32, i32) {
    %c0_i32 = arith.constant 0 : i32
    %c0_i32_0 = arith.constant 0 : i32
    %c0_i32_1 = arith.constant 0 : i32
    return %c0_i32, %c0_i32_0 : i32, i32
  }
  func.func @transform_6(%arg0: i32) -> (i32, i32) {
    %c0_i32 = arith.constant 0 : i32
    %c0_i32_0 = arith.constant 0 : i32
    %c0_i32_1 = arith.constant 0 : i32
    return %c0_i32, %c0_i32_0 : i32, i32
  }
  func.func @transform_7(%arg0: i32) -> (i32, i32) {
    %c0_i32 = arith.constant 0 : i32
    %c0_i32_0 = arith.constant 0 : i32
    %c0_i32_1 = arith.constant 0 : i32
    return %c0_i32, %c0_i32_0 : i32, i32
  }
  func.func @transform_8(%arg0: i32) -> (i32, i32) {
    %c0_i32 = arith.constant 0 : i32
    %c0_i32_0 = arith.constant 0 : i32
    %c0_i32_1 = arith.constant 0 : i32
    return %c0_i32, %c0_i32_0 : i32, i32
  }
  func.func @transform_9(%arg0: i32) -> (i32, i32) {
    %c0_i32 = arith.constant 0 : i32
    %c0_i32_0 = arith.constant 0 : i32
    return %arg0, %c0_i32 : i32, i32
  }
}

</mosaic_0001>

<bundles_post_ra>
// kernel: tpu_custom_call.1
= control target key start
LH: loop header
LB: loop body
LE: loop exit
PB: predicated region body
PF: predicated region fallthrough
CT: control target
= control target key end

     0   :  { %14 = vsyncpa [#allocation3], 0  ;;  %s1240_s0 = inlined_call_operand.hbm [shape: f32[2,16], index: 0, kind: input, shape index: {}]   ;;  %s1241_s1 = inlined_call_operand.hbm [shape: f32[3,64], index: 1, kind: input, shape index: {}]   ;;  %s1242_s2 = inlined_call_operand.vmem [shape: f32[1,64], index: 2, kind: input, shape index: {}]   ;;  %s1243_s3 = inlined_call_operand.hbm [shape: f32[8,64,256], index: 3, kind: input, shape index: {}]   ;;  %s1244_s4 = inlined_call_operand.vmem [shape: f32[1,256], index: 4, kind: input, shape index: {}]   ;;  %s1245_s5 = inlined_call_operand.hbm [shape: f32[256,128], index: 5, kind: input, shape index: {}]   ;;  %s1246_s6 = inlined_call_operand.vmem [shape: f32[1,128], index: 6, kind: input, shape index: {}]   ;;  %s1247_s7 = inlined_call_operand.hbm [shape: f32[128,128], index: 7, kind: input, shape index: {}]   ;;  %s1248_s8 = inlined_call_operand.vmem [shape: f32[1,128], index: 8, kind: input, shape index: {}]   ;;  %s1249_s9 = inlined_call_operand.hbm [shape: f32[2,128], index: 9, kind: output, shape index: {}]  }
   0x1   :  { %15 = vsyncpa [#allocation6], 0 }
   0x2   :  { %16 = vsyncpa [#allocation9], 0  ;;  %s34_s11 = sshll.u32 %s1241_s1, 4  ;;  %s35_s11 = int_to_ptr.hbm [resolvable:$true] %s34_s11 }
   0x3   :  { %17 = vsyncpa [#allocation4], 0  ;;  %s1095_s12 = smov [#allocation5]   ;;  %s61_s16 = sshll.u32 %s1245_s5, 4  ;;  %s62_s16 = int_to_ptr.hbm [resolvable:$true] %s61_s16 }
   0x4   :  { %s36_s13 = sshll.u32 %s1095_s12, 4  ;;  %s1096_s17 = smov [#allocation8]   ;;  %s37_s13 = int_to_ptr.vmem [resolvable:$true] %s36_s13 }
   0x5   :  { %39 = dma.hbm_to_vmem [thread:$0]  %s35_s11, 64, %s37_s13, [#allocation6]  }
   0x6   :  { %s63_s18 = sshll.u32 %s1096_s17, 4  ;;  %s1097_s19 = smov 128   ;;  %s64_s18 = int_to_ptr.vmem [resolvable:$true] %s63_s18 }
   0x7   :  { %s1098_s20 = smov 8   ;;  %s23_s1 = sshll.u32 %s1240_s0, 4  ;;  %s24_s1 = int_to_ptr.hbm [resolvable:$true] %s23_s1 }
   0x8   :  { %69 = dma.hbm_to_vmem [thread:$0]  %s62_s16, 4096, %s64_s18, [#allocation9], %s1097_s19, %s1097_s19, %s1098_s20  }
   0x9   :  { %s1099_s23 = smov [#allocation2]   ;;  %s46_s5 = sshll.u32 %s1243_s3, 4  ;;  %s47_s5 = int_to_ptr.hbm [resolvable:$true] %s46_s5 }
   0xa   :  { %s25_s24 = sshll.u32 %s1099_s23, 4  ;;  %s1100_s27 = smov [#allocation7]   ;;  %s26_s24 = int_to_ptr.vmem [resolvable:$true] %s25_s24 }
   0xb   :  { %28 = dma.hbm_to_vmem [thread:$0]  %s24_s1, 32, %s26_s24, [#allocation3]  }
   0xc   :  { %s48_s28 = sshll.u32 %s1100_s27, 4  ;;  %s1101_s29 = smov 256   ;;  %s49_s28 = int_to_ptr.vmem [resolvable:$true] %s48_s28 }
   0xd   :  { %s1102_s30 = smov 16   ;;  %s76_s0 = sshll.u32 %s1247_s7, 4  ;;  %s77_s0 = int_to_ptr.hbm [resolvable:$true] %s76_s0 }
   0xe   :  { %54 = dma.hbm_to_vmem [thread:$0]  %s47_s5, 16384, %s49_s28, [#allocation6], %s1101_s29, %s1101_s29, %s1102_s30  }
   0xf   :  { %s1103_s12 = smov [#allocation10]  }
  0x10   :  { %s78_s13 = sshll.u32 %s1103_s12, 4  ;;  %s79_s13 = int_to_ptr.vmem [resolvable:$true] %s78_s13 }
  0x11   :  { %84 = dma.hbm_to_vmem [thread:$0]  %s77_s0, 2048, %s79_s13, [#allocation9], %s1097_s19, %s1097_s19, %s1098_s20  }
  0x12   :  { %1087 = dma.done.wait [#allocation3], 32  }
  0x13   :  { %1088 = vsyncadd [#allocation3], 4294967264 }
  0x14   :  { %1089 = dma.done.wait [#allocation6], 16448  }
  0x15   :  { %1090 = vsyncadd [#allocation6], 4294950848 }
  0x16   :  { %1091 = dma.done.wait [#allocation9], 6144  }
  0x17   :  { %1092 = vsyncadd [#allocation9], 4294961152  ;;  %v118_v0 = vlaneseq  ;;  %v107_v2 = vld [vmem:[#allocation2] sm:$0x3]  ;;  %s1104_s3 = smov 1   ;;  %vm112_vm0 = vcmask 7168  }
  0x18   :  { %109 = vrot.lane.b32.xlu0 %v107_v2, %s1104_s3  ;;  %v130_v3 = vperm.slane %v107_v2, 1  ;;  %v117_v4 = vperm.slane %v107_v2, 0  ;;  %vm114_vm1 = vcmask 138240   ;;  %v267_v13 = vld [vmem:[#allocation7 + $0xf0] sm:$0xff]  ;;  %v265_v14 = vld [vmem:[#allocation7 + $0xe0] sm:$0xff]  ;;  %v268_v18 = vld [vmem:[#allocation7 + $0xf8] sm:$0xff] }
  0x19   :  { %v119_v1 = vshrl.u32 %v118_v0, 7  ;;  %286 = vmatpush.msra.mxu3 %v267_v13  ;;  %v263_v15 = vld [vmem:[#allocation7 + $0xd0] sm:$0xff]  ;;  %v261_v16 = vld [vmem:[#allocation7 + $0xc0] sm:$0xff]  ;;  %306 = vmatpush.msra.mxu1 %v268_v18  ;;  %v266_v21 = vld [vmem:[#allocation7 + $0xe8] sm:$0xff]  ;;  %vm273_vm2 = vcmask 1041409   ;;  %vm275_vm3 = vcmask 523264  }
  0x1a   :  { %v259_v17 = vld [vmem:[#allocation7 + $0xb0] sm:$0xff]  ;;  %v257_v20 = vld [vmem:[#allocation7 + $0xa0] sm:$0xff]  ;;  %v264_v24 = vld [vmem:[#allocation7 + $0xd8] sm:$0xff]  ;;  %s1105_s19 = smov [#allocation11]   ;;  %s890_s1 = sshll.u32 %s1249_s9, 4  ;;  %s891_s1 = int_to_ptr.hbm [resolvable:$true] %s890_s1 }
  0x1b   :  { %930 = vset.pattern.permute.xlu1 %v119_v1  ;;  %931 = vset.pattern.permute.xlu2 %v119_v1  ;;  %v126_v5 = vadd.s32 8, %v119_v1  ;;  %v191_v11 = vadd.s32 10, %v119_v1  ;;  %v185_v12 = vadd.s32 2, %v119_v1  ;;  %v250_v19 = vld [vmem:[#allocation7 + $0x70] sm:$0xff]  ;;  %v248_v22 = vld [vmem:[#allocation7 + $0x60] sm:$0xff]  ;;  %v262_v27 = vld [vmem:[#allocation7 + $0xc8] sm:$0xff] }
  0x1c   :  { %929 = vset.pattern.permute.xlu0 %v119_v1  ;;  %287 = vmatpush.msra.mxu3 %v265_v14  ;;  %v255_v23 = vld [vmem:[#allocation7 + $0x90] sm:$0xff]  ;;  %v253_v26 = vld [vmem:[#allocation7 + $0x80] sm:$0xff]  ;;  %v251_v29 = vld [vmem:[#allocation7 + $0x78] sm:$0xff]  ;;  %s888_s20 = sshll.u32 %s1105_s19, 4  ;;  %s889_s20 = int_to_ptr.vmem [resolvable:$true] %s888_s20 }
  0x1d   :  { %330 = vmatpush.msra.mxu2 %v250_v19  ;;  %307 = vmatpush.msra.mxu1 %v266_v21  ;;  %v246_v25 = vld [vmem:[#allocation7 + $0x50] sm:$0xff]  ;;  %v244_v28 = vld [vmem:[#allocation7 + $0x40] sm:$0xff]  ;;  %v260_v31 = vld [vmem:[#allocation7 + $0xb8] sm:$0xff] }
  0x1e   :  { %288 = vmatpush.msra.mxu3 %v263_v15  ;;  %v377_v30 = vld [vmem:[#allocation7 + $0x170] sm:$0xff]  ;;  %v249_v33 = vld [vmem:[#allocation7 + $0x68] sm:$0xff]  ;;  %v375_v34 = vld [vmem:[#allocation7 + $0x160] sm:$0xff] }
  0x1f   :  { %331 = vmatpush.msra.mxu2 %v248_v22  ;;  %308 = vmatpush.msra.mxu1 %v264_v24  ;;  %v242_v32 = vld [vmem:[#allocation7 + $0x30] sm:$0xff]  ;;  %v258_v35 = vld [vmem:[#allocation7 + $0xa8] sm:$0xff]  ;;  %v240_v36 = vld [vmem:[#allocation7 + $0x20] sm:$0xff] }
  0x20   :  { %289 = vmatpush.msra.mxu3 %v261_v16  ;;  %392 = vmatpush.msra.mxu0 %v377_v30  ;;  %v247_v37 = vld [vmem:[#allocation7 + $0x58] sm:$0xff]  ;;  %v373_v38 = vld [vmem:[#allocation7 + $0x150] sm:$0xff]  ;;  %v245_v41 = vld [vmem:[#allocation7 + $0x48] sm:$0xff] }
  0x21   :  { %332 = vmatpush.msra.mxu2 %v246_v25  ;;  %309 = vmatpush.msra.mxu1 %v262_v27  ;;  %v256_v39 = vld [vmem:[#allocation7 + $0x98] sm:$0xff]  ;;  %v238_v40 = vld [vmem:[#allocation7 + $0x10] sm:$0xff]  ;;  %v371_v42 = vld [vmem:[#allocation7 + $0x140] sm:$0xff] }
  0x22   :  { %290 = vmatpush.msra.mxu3 %v259_v17  ;;  %393 = vmatpush.msra.mxu0 %v375_v34  ;;  %v254_v43 = vld [vmem:[#allocation7 + $0x88] sm:$0xff]  ;;  %v236_v44 = vld [vmem:[#allocation7] sm:$0xff]  ;;  %v243_v46 = vld [vmem:[#allocation7 + $0x38] sm:$0xff] }
  0x23   :  { %135 = vperm.xlu1 %930, %v130_v3   ;;  %333 = vmatpush.msra.mxu2 %v244_v28  ;;  %v369_v47 = vld [vmem:[#allocation7 + $0x130] sm:$0xff]  ;;  %v378_v48 = vld [vmem:[#allocation7 + $0x178] sm:$0xff]  ;;  %v241_v51 = vld [vmem:[#allocation7 + $0x28] sm:$0xff] }
  0x24   :  { %122 = vperm.xlu0 %929, %v117_v4   ;;  %291 = vmatpush.msra.mxu3 %v257_v20  ;;  %v116_v49 = vld [vmem:[#allocation5] sm:$0x7]  ;;  %v441_v50 = vld [vmem:[#allocation7 + $0x1f0] sm:$0xff]  ;;  %v367_v52 = vld [vmem:[#allocation7 + $0x120] sm:$0xff] }
  0x25   :  { %310 = vmatpush.msra.mxu1 %v260_v31  ;;  %334 = vmatpush.msra.mxu2 %v242_v32  ;;  %v376_v53 = vld [vmem:[#allocation7 + $0x168] sm:$0xff]  ;;  %v439_v55 = vld [vmem:[#allocation7 + $0x1e0] sm:$0xff]  ;;  %v239_v56 = vld [vmem:[#allocation7 + $0x18] sm:$0xff]  ;;  %v1173_v0 = vperm.slane %v116_v49, 1  ;;  %v1175_v2 = vperm.slane %v116_v49, 0 }
  0x26   :  { %292 = vmatpush.msra.mxu3 %v255_v23  ;;  %394 = vmatpush.msra.mxu0 %v373_v38  ;;  %v365_v57 = vld [vmem:[#allocation7 + $0x110] sm:$0xff]  ;;  %v374_v58 = vld [vmem:[#allocation7 + $0x158] sm:$0xff]  ;;  %v237_v60 = vld [vmem:[#allocation7 + $0x8] sm:$0xff] }
  0x27   :  { %311 = vmatpush.msra.mxu1 %v258_v35  ;;  %335 = vmatpush.msra.mxu2 %v240_v36  ;;  %v437_v59 = vld [vmem:[#allocation7 + $0x1d0] sm:$0xff]  ;;  %v363_v62 = vld [vmem:[#allocation7 + $0x100] sm:$0xff]  ;;  %v372_v63 = vld [vmem:[#allocation7 + $0x148] sm:$0xff] }
  0x28   :  { %293 = vmatpush.msra.mxu3 %v253_v26  ;;  %395 = vmatpush.msra.mxu0 %v371_v42  ;;  %v435_v1 = vld [vmem:[#allocation7 + $0x1c0] sm:$0xff]  ;;  %v366_v14 = vld [vmem:[#allocation7 + $0x118] sm:$0xff]  ;;  %v429_v15 = vld [vmem:[#allocation7 + $0x190] sm:$0xff] }
  0x29   :  { %312 = vmatpush.msra.mxu1 %v256_v39  ;;  %336 = vmatpush.msra.mxu2 %v238_v40  ;;  %v1185_v16 = vld [vmem:[%s1242_s2] ss:$0 sm:$0xff]  ;;  %v364_v18 = vld [vmem:[#allocation7 + $0x108] sm:$0xff]  ;;  %v427_v19 = vld [vmem:[#allocation7 + $0x180] sm:$0xff] }
  0x2a   :  { %350 = vmatpush.msrb.mxu3 %v251_v29  ;;  %396 = vmatpush.msra.mxu0 %v369_v47  ;;  %v513_v20 = vld [vmem:[#allocation7 + $0x270] sm:$0xff]  ;;  %v511_v21 = vld [vmem:[#allocation7 + $0x260] sm:$0xff] }
  0x2b   :  { %313 = vmatpush.msra.mxu1 %v254_v43  ;;  %337 = vmatpush.msra.mxu2 %v236_v44  ;;  %v509_v25 = vld [vmem:[#allocation7 + $0x250] sm:$0xff]  ;;  %v507_v27 = vld [vmem:[#allocation7 + $0x240] sm:$0xff] }
  0x2c   :  { %935 = vset.pattern.permute.xlu0 %v126_v5  ;;  %351 = vmatpush.msrb.mxu3 %v249_v33  ;;  %v505_v32 = vld [vmem:[#allocation7 + $0x230] sm:$0xff]  ;;  %v503_v34 = vld [vmem:[#allocation7 + $0x220] sm:$0xff] }
  0x2d   :  { %412 = vmatpush.msrb.mxu1 %v378_v48  ;;  %456 = vmatpush.msrb.mxu2 %v441_v50  ;;  %v499_v39 = vld [vmem:[#allocation7 + $0x200] sm:$0xff] }
  0x2e   :  { %352 = vmatpush.msrb.mxu3 %v247_v37  ;;  %397 = vmatpush.msra.mxu0 %v367_v52  ;;  %v501_v37 = vld [vmem:[#allocation7 + $0x210] sm:$0xff] }
  0x2f   :  { %413 = vmatpush.msrb.mxu1 %v376_v53  ;;  %457 = vmatpush.msrb.mxu2 %v439_v55  ;;  %v442_v53 = vld [vmem:[#allocation7 + $0x1f8] sm:$0xff] }
  0x30   :  { %353 = vmatpush.msrb.mxu3 %v245_v41  ;;  %398 = vmatpush.msra.mxu0 %v365_v57  ;;  %v642_v57 = vld [vmem:[#allocation7 + $0x370] sm:$0xff] }
  0x31   :  { %414 = vmatpush.msrb.mxu1 %v374_v58  ;;  %458 = vmatpush.msrb.mxu2 %v437_v59 }
  0x32   :  { %354 = vmatpush.msrb.mxu3 %v243_v46  ;;  %399 = vmatpush.msra.mxu0 %v363_v62  ;;  %v576_v62 = vld [vmem:[#allocation7 + $0x2e0] sm:$0xff] }
  0x33   :  { %415 = vmatpush.msrb.mxu1 %v372_v63  ;;  %459 = vmatpush.msrb.mxu2 %v435_v1  ;;  %v640_v63 = vld [vmem:[#allocation7 + $0x360] sm:$0xff] }
  0x34   :  { %141 = vperm.xlu0 %935, %v130_v3   ;;  %355 = vmatpush.msrb.mxu3 %v241_v51 }
  0x35   :  { %529 = vmatpush.msrb.mxu0 %v513_v20  ;;  %v432_v20 = vld [vmem:[#allocation7 + $0x1a8] sm:$0xff] }
  0x36   :  { %356 = vmatpush.msrb.mxu3 %v239_v56  ;;  %v578_v56 = vld [vmem:[#allocation7 + $0x2f0] sm:$0xff] }
  0x37   :  { %530 = vmatpush.msrb.mxu0 %v511_v21  ;;  %v506_v21 = vld [vmem:[#allocation7 + $0x238] sm:$0xff] }
  0x38   :  { %357 = vmatpush.msrb.mxu3 %v237_v60  ;;  %v440_v60 = vld [vmem:[#allocation7 + $0x1e8] sm:$0xff] }
  0x39   :  { %531 = vmatpush.msrb.mxu0 %v509_v25  ;;  %v430_v25 = vld [vmem:[#allocation7 + $0x198] sm:$0xff] }
  0x3b   :  { %532 = vmatpush.msrb.mxu0 %v507_v27  ;;  %v504_v27 = vld [vmem:[#allocation7 + $0x228] sm:$0xff] }
  0x3c   :  { %939 = vset.pattern.permute.xlu0 %v191_v11 }
  0x3d   :  { %533 = vmatpush.msrb.mxu0 %v505_v32  ;;  %v502_v32 = vld [vmem:[#allocation7 + $0x218] sm:$0xff] }
  0x3f   :  { %534 = vmatpush.msrb.mxu0 %v503_v34  ;;  %v566_v34 = vld [vmem:[#allocation7 + $0x290] sm:$0xff] }
  0x41   :  { %535 = vmatpush.msrb.mxu0 %v501_v37  ;;  %v500_v37 = vld [vmem:[#allocation7 + $0x208] sm:$0xff] }
  0x43   :  { %536 = vmatpush.msrb.mxu0 %v499_v39  ;;  %v577_v39 = vld [vmem:[#allocation7 + $0x2e8] sm:$0xff] }
  0x8a   :  { %v110_v6 = vpop.permute.xlu0 %109 }
  0x8b   :  { %v113_v7 = vsel %vm112_vm0, 0.0, %v110_v6  ;;  %v1179_v6 = vperm.slane %v116_v49, 2 }
  0x8c   :  { %v115_v8 = vsel %vm114_vm1, %v113_v7, 0.0  ;;  %v370_v7 = vld [vmem:[#allocation7 + $0x138] sm:$0xff] }
  0x8d   :  { %v148_v9 = vperm.slane %v115_v8, 0  ;;  %v161_v10 = vperm.slane %v115_v8, 1  ;;  %v433_v8 = vld [vmem:[#allocation7 + $0x1b0] sm:$0xff]  ;;  %416 = vmatpush.msrb.mxu1 %v370_v7 }
  0x8e   :  { %460 = vmatpush.msrb.mxu2 %v433_v8  ;;  %v574_v7 = vld [vmem:[#allocation7 + $0x2d0] sm:$0xff] }
  0x8f   :  { %166 = vperm.xlu2 %931, %v161_v10   ;;  %153 = vperm.xlu1 %930, %v148_v9   ;;  %v638_v8 = vld [vmem:[#allocation7 + $0x350] sm:$0xff] }
  0x95   :  { %v1171_v45 = vpop.permute.xlu1 %135 }
  0x96   :  { %v123_v61 = vpop.permute.xlu0 %122  ;;  %v146_v24 = vmul.f32 %v1173_v0, %v1171_v45 }
  0x97   :  { %932 = vset.pattern.permute.xlu2 %v185_v12  ;;  %933 = vset.pattern.permute.xlu1 %v185_v12  ;;  %v431_v12 = vld [vmem:[#allocation7 + $0x1a0] sm:$0xff] }
  0x98   :  { %461 = vmatpush.msrb.mxu2 %v431_v12 }
  0x9a   :  { %462 = vmatpush.msrb.mxu2 %v429_v15 }
  0x9c   :  { %463 = vmatpush.msrb.mxu2 %v427_v19  ;;  %v636_v19 = vld [vmem:[#allocation7 + $0x340] sm:$0xff] }
  0x9f   :  { %187 = vperm.xlu2 %932, %v148_v9   ;;  %199 = vperm.xlu1 %933, %v161_v10  }
  0xa6   :  { %v142_v49 = vpop.permute.xlu0 %141 }
  0xa7   :  { %934 = vset.pattern.permute.xlu2 %v126_v5  ;;  %936 = vset.pattern.permute.xlu1 %v126_v5  ;;  %v147_v59 = vmul.f32 %v1173_v0, %v142_v49  ;;  %v639_v49 = vld [vmem:[#allocation7 + $0x358] sm:$0xff] }
  0xaf   :  { %159 = vperm.xlu1 %936, %v148_v9   ;;  %128 = vperm.xlu2 %934, %v117_v4   ;;  %v144_v4 = vmul.f32 %v1173_v0, %v123_v61  ;;  %v512_v61 = vld [vmem:[#allocation7 + $0x268] sm:$0xff] }
  0xb7   :  { %937 = vset.pattern.permute.xlu1 %v191_v11  ;;  %172 = vperm.xlu2 %934, %v161_v10  }
  0xbf   :  { %193 = vperm.xlu1 %937, %v148_v9   ;;  %938 = vset.pattern.permute.xlu2 %v191_v11  ;;  %v368_v11 = vld [vmem:[#allocation7 + $0x128] sm:$0xff] }
  0xc0   :  { %417 = vmatpush.msrb.mxu1 %v368_v11 }
  0xc2   :  { %418 = vmatpush.msrb.mxu1 %v366_v14  ;;  %v508_v14 = vld [vmem:[#allocation7 + $0x248] sm:$0xff] }
  0xc4   :  { %419 = vmatpush.msrb.mxu1 %v364_v18  ;;  %v572_v18 = vld [vmem:[#allocation7 + $0x2c0] sm:$0xff] }
  0xc7   :  { %205 = vperm.xlu2 %938, %v161_v10  }
  0xe9   :  { %v167_v54 = vpop.permute.xlu2 %166 }
  0xea   :  { %v177_v23 = vmul.f32 %v1175_v2, %v167_v54  ;;  %v514_v54 = vld [vmem:[#allocation7 + $0x278] sm:$0xff] }
  0xec   :  { %v181_v30 = vadd.f32 %v177_v23, %v146_v24  ;;  %v634_v23 = vld [vmem:[#allocation7 + $0x330] sm:$0xff] }
  0xf9   :  { %v188_v9 = vpop.permute.xlu2 %187 }
  0xfa   :  { %v208_v13 = vmul.f32 %v1179_v6, %v188_v9 }
 0x101   :  { %v154_v3 = vpop.permute.xlu1 %153 }
 0x102   :  { %v175_v5 = vmul.f32 %v1175_v2, %v154_v3  ;;  %v438_v3 = vld [vmem:[#allocation7 + $0x1d8] sm:$0xff] }
 0x104   :  { %v179_v10 = vadd.f32 %v175_v5, %v144_v4  ;;  %v510_v4 = vld [vmem:[#allocation7 + $0x258] sm:$0xff] }
 0x106   :  { %v212_v17 = vadd.f32 %v208_v13, %v179_v10  ;;  %v436_v10 = vld [vmem:[#allocation7 + $0x1c8] sm:$0xff]  ;;  %v434_v13 = vld [vmem:[#allocation7 + $0x1b8] sm:$0xff] }
 0x108   :  { %v220_v22 = vadd.f32 %v1185_v16, %v212_v17 }
 0x109   :  { %v1191_v26 = vpop.permute.xlu2 %128 }
 0x10a   :  { %v224_v28 = vmax.f32 %v220_v22, 0.0  ;;  %v570_v22 = vld [vmem:[#allocation7 + $0x2b0] sm:$0xff] }
 0x10c   :  { %v230_v35 = vrot.slane %v224_v28, 1 }
 0x10e   :  { %v234_v40 = vmax.f32 %v224_v28, %v230_v35  ;;  %v568_v28 = vld [vmem:[#allocation7 + $0x2a0] sm:$0xff]  ;;  %v145_v35 = vmul.f32 %v1173_v0, %v1191_v26  ;;  %v641_v0 = vld [vmem:[#allocation7 + $0x368] sm:$0xff] }
 0x110   :  { %v271_v44 = vrot.slane %v234_v40, 2  ;;  %v379_v47 = vrot.slane %v234_v40, 4  ;;  %v443_v11 = vrot.slane %v234_v40, 6 }
 0x111   :  { %v200_v29 = vpop.permute.xlu1 %199  ;;  %v173_v41 = vpop.permute.xlu2 %172 }
 0x112   :  { %v210_v31 = vmul.f32 %v1179_v6, %v200_v29  ;;  %v178_v58 = vmul.f32 %v1175_v2, %v173_v41  ;;  %v632_v29 = vld [vmem:[#allocation7 + $0x320] sm:$0xff] }
 0x114   :  { %v214_v33 = vadd.f32 %v210_v31, %v181_v30  ;;  %v182_v9 = vadd.f32 %v178_v58, %v147_v59  ;;  %v428_v31 = vld [vmem:[#allocation7 + $0x188] sm:$0xff]  ;;  %v700_v59 = vld [vmem:[#allocation7 + $0x3c0] sm:$0xff] }
 0x116   :  { %v222_v36 = vadd.f32 %v1185_v16, %v214_v33  ;;  %v579_v33 = vld [vmem:[#allocation7 + $0x2f8] sm:$0xff] }
 0x118   :  { %v226_v38 = vmax.f32 %v222_v36, 0.0 }
 0x11a   :  { %v231_v42 = vrot.slane %v226_v38, 1 }
 0x11c   :  { %v235_v43 = vmax.f32 %v226_v38, %v231_v42  ;;  %v564_v42 = vld [vmem:[#allocation7 + $0x280] sm:$0xff] }
 0x11e   :  { %v272_v45 = vrot.slane %v235_v43, 1  ;;  %v318_v46 = vrot.slane %v235_v43, 7  ;;  %v380_v48 = vrot.slane %v235_v43, 3  ;;  %v444_v5 = vrot.slane %v235_v43, 5  ;;  %v630_v43 = vld [vmem:[#allocation7 + $0x310] sm:$0xff] }
 0x120   :  { %v274_v50 = vsel %vm273_vm2, %v272_v45, %v271_v44  ;;  %v319_v51 = vsel %vm273_vm2, %v318_v46, %v234_v40  ;;  %v381_v52 = vsel %vm273_vm2, %v380_v48, %v379_v47  ;;  %v445_v17 = vsel %vm273_vm2, %v444_v5, %v443_v11  ;;  %v575_v44 = vld [vmem:[#allocation7 + $0x2d8] sm:$0xff]  ;;  %v706_v46 = vld [vmem:[#allocation7 + $0x3f0] sm:$0xff]  ;;  %v628_v47 = vld [vmem:[#allocation7 + $0x300] sm:$0xff] }
 0x121   :  { %v206_v55 = vpop.permute.xlu2 %205  ;;  %902 = vmatmul.msk.f32.vlgmr.msra.gmra.mxu3 %vm275_vm3, %v274_v50  ;;  %903 = vmatmul.msk.f32.vlgmr.msra.gmra.mxu1 %vm275_vm3, %v274_v50  ;;  %v160_v15 = vpop.permute.xlu1 %159  ;;  %v573_v48 = vld [vmem:[#allocation7 + $0x2c8] sm:$0xff]  ;;  %v704_v50 = vld [vmem:[#allocation7 + $0x3e0] sm:$0xff] }
 0x122   :  { %904 = vmatmul.msk.f32.vlgmr.msra.gmra.mxu2 %vm275_vm3, %v319_v51  ;;  %906 = vmatmul.msk.f32.vlgmr.msra.gmra.mxu0 %vm275_vm3, %v381_v52  ;;  %v211_v1 = vmul.f32 %v1179_v6, %v206_v55  ;;  %v176_v30 = vmul.f32 %v1175_v2, %v160_v15  ;;  %v643_v2 = vld [vmem:[#allocation7 + $0x378] sm:$0xff]  ;;  %v702_v55 = vld [vmem:[#allocation7 + $0x3d0] sm:$0xff]  ;;  %v696_v11 = vld [vmem:[#allocation7 + $0x3a0] sm:$0xff] }
 0x123   :  { %476 = vmatpush.msra.mxu3 %v442_v53  ;;  %549 = vmatpush.msra.mxu1 %v514_v54 }
 0x124   :  { %593 = vmatpush.msra.mxu2 %v578_v56  ;;  %657 = vmatpush.msra.mxu0 %v642_v57  ;;  %v215_v12 = vadd.f32 %v211_v1, %v182_v9  ;;  %v180_v40 = vadd.f32 %v176_v30, %v145_v35  ;;  %v569_v56 = vld [vmem:[#allocation7 + $0x2a8] sm:$0xff]  ;;  %v635_v57 = vld [vmem:[#allocation7 + $0x338] sm:$0xff]  ;;  %v698_v1 = vld [vmem:[#allocation7 + $0x3b0] sm:$0xff] }
 0x125   :  { %477 = vmatpush.msra.mxu3 %v440_v60  ;;  %550 = vmatpush.msra.mxu1 %v512_v61  ;;  %v633_v60 = vld [vmem:[#allocation7 + $0x328] sm:$0xff]  ;;  %v779_v30 = vld [vmem:[#allocation8 + $0x70] sm:$0xff]  ;;  %v776_v35 = vld [vmem:[#allocation8 + $0x58] sm:$0xff] }
 0x126   :  { %594 = vmatpush.msra.mxu2 %v576_v62  ;;  %658 = vmatpush.msra.mxu0 %v640_v63  ;;  %v223_v24 = vadd.f32 %v1185_v16, %v215_v12  ;;  %v565_v63 = vld [vmem:[#allocation7 + $0x288] sm:$0xff] }
 0x127   :  { %478 = vmatpush.msra.mxu3 %v438_v3  ;;  %551 = vmatpush.msra.mxu1 %v510_v4  ;;  %v707_v4 = vld [vmem:[#allocation7 + $0x3f8] sm:$0xff]  ;;  %v629_v12 = vld [vmem:[#allocation7 + $0x308] sm:$0xff] }
 0x128   :  { %595 = vmatpush.msra.mxu2 %v574_v7  ;;  %659 = vmatpush.msra.mxu0 %v638_v8  ;;  %v227_v36 = vmax.f32 %v223_v24, 0.0  ;;  %v631_v8 = vld [vmem:[#allocation7 + $0x318] sm:$0xff] }
 0x129   :  { %479 = vmatpush.msra.mxu3 %v436_v10  ;;  %907 = vmatmul.msk.f32.vlgmr.msrb.gmra.mxu1 %vm275_vm3, %v381_v52  ;;  %v637_v52 = vld [vmem:[#allocation7 + $0x348] sm:$0xff] }
 0x12a   :  { %905 = vmatmul.msk.f32.vlgmr.msrb.gmra.mxu3 %vm275_vm3, %v319_v51  ;;  %908 = vmatmul.msk.f32.vlgmr.msrb.gmra.mxu2 %vm275_vm3, %v445_v17  ;;  %v493_v26 = vrot.slane %v227_v36, 1  ;;  %v571_v51 = vld [vmem:[#allocation7 + $0x2b8] sm:$0xff]  ;;  %v705_v10 = vld [vmem:[#allocation7 + $0x3e8] sm:$0xff] }
 0x12b   :  { %480 = vmatpush.msra.mxu3 %v434_v13  ;;  %552 = vmatpush.msra.mxu1 %v508_v14  ;;  %v703_v13 = vld [vmem:[#allocation7 + $0x3d8] sm:$0xff]  ;;  %v694_v14 = vld [vmem:[#allocation7 + $0x390] sm:$0xff] }
 0x12c   :  { %596 = vmatpush.msra.mxu2 %v572_v18  ;;  %660 = vmatpush.msra.mxu0 %v636_v19  ;;  %v497_v53 = vmax.f32 %v227_v36, %v493_v26  ;;  %v794_v36 = vld [vmem:[#allocation8 + $0xe8] sm:$0xff] }
 0x12d   :  { %481 = vmatpush.msra.mxu3 %v432_v20  ;;  %553 = vmatpush.msra.mxu1 %v506_v21  ;;  %v692_v20 = vld [vmem:[#allocation7 + $0x380] sm:$0xff]  ;;  %v770_v26 = vld [vmem:[#allocation8 + $0x28] sm:$0xff] }
 0x12e   :  { %597 = vmatpush.msra.mxu2 %v570_v22  ;;  %661 = vmatpush.msra.mxu0 %v634_v23  ;;  %v517_v62 = vrot.slane %v497_v53, 7  ;;  %v581_v7 = vrot.slane %v497_v53, 1  ;;  %v645_v18 = vrot.slane %v497_v53, 3  ;;  %v699_v22 = vld [vmem:[#allocation7 + $0x3b8] sm:$0xff]  ;;  %v709_v23 = vrot.slane %v497_v53, 5 }
 0x12f   :  { %482 = vmatpush.msra.mxu3 %v430_v25  ;;  %554 = vmatpush.msra.mxu1 %v504_v27  ;;  %v697_v25 = vld [vmem:[#allocation7 + $0x3a8] sm:$0xff]  ;;  %v695_v27 = vld [vmem:[#allocation7 + $0x398] sm:$0xff] }
 0x130   :  { %598 = vmatpush.msra.mxu2 %v568_v28  ;;  %662 = vmatpush.msra.mxu0 %v632_v29  ;;  %v693_v28 = vld [vmem:[#allocation7 + $0x388] sm:$0xff]  ;;  %v780_v29 = vld [vmem:[#allocation8 + $0x78] sm:$0xff] }
 0x131   :  { %483 = vmatpush.msra.mxu3 %v428_v31  ;;  %v194_v38 = vpop.permute.xlu1 %193  ;;  %555 = vmatpush.msra.mxu1 %v502_v32  ;;  %v778_v31 = vld [vmem:[#allocation8 + $0x68] sm:$0xff]  ;;  %v796_v32 = vld [vmem:[#allocation8 + $0xf8] sm:$0xff] }
 0x132   :  { %v209_v41 = vmul.f32 %v1179_v6, %v194_v38  ;;  %599 = vmatpush.msra.mxu2 %v566_v34  ;;  %909 = vmatmul.msk.f32.vlgmr.msra.gmra.mxu3 %vm275_vm3, %v445_v17  ;;  %v701_v17 = vld [vmem:[#allocation7 + $0x3c8] sm:$0xff]  ;;  %v777_v34 = vld [vmem:[#allocation8 + $0x60] sm:$0xff] }
 0x133   :  { %613 = vmatpush.msrb.mxu3 %v579_v33  ;;  %556 = vmatpush.msra.mxu1 %v500_v37  ;;  %v795_v33 = vld [vmem:[#allocation8 + $0xf0] sm:$0xff]  ;;  %v793_v38 = vld [vmem:[#allocation8 + $0xe0] sm:$0xff] }
 0x134   :  { %v213_v45 = vadd.f32 %v209_v41, %v180_v40  ;;  %600 = vmatpush.msra.mxu2 %v564_v42  ;;  %663 = vmatpush.msra.mxu0 %v630_v43  ;;  %v775_v37 = vld [vmem:[#allocation8 + $0x50] sm:$0xff]  ;;  %v773_v40 = vld [vmem:[#allocation8 + $0x40] sm:$0xff]  ;;  %v772_v42 = vld [vmem:[#allocation8 + $0x38] sm:$0xff] }
 0x135   :  { %614 = vmatpush.msrb.mxu3 %v577_v39  ;;  %677 = vmatpush.msrb.mxu1 %v643_v2  ;;  %v774_v39 = vld [vmem:[#allocation8 + $0x48] sm:$0xff]  ;;  %v792_v2 = vld [vmem:[#allocation8 + $0xd8] sm:$0xff]  ;;  %v791_v41 = vld [vmem:[#allocation8 + $0xd0] sm:$0xff] }
 0x136   :  { %v221_v6 = vadd.f32 %v1185_v16, %v213_v45  ;;  %721 = vmatpush.msrb.mxu2 %v706_v46  ;;  %664 = vmatpush.msra.mxu0 %v628_v47  ;;  %v567_v16 = vld [vmem:[#allocation7 + $0x298] sm:$0xff]  ;;  %v790_v43 = vld [vmem:[#allocation8 + $0xc8] sm:$0xff]  ;;  %v769_v46 = vld [vmem:[#allocation8 + $0x20] sm:$0xff] }
 0x137   :  { %615 = vmatpush.msrb.mxu3 %v575_v44  ;;  %678 = vmatpush.msrb.mxu1 %v641_v0  ;;  %v771_v44 = vld [vmem:[#allocation8 + $0x30] sm:$0xff]  ;;  %v789_v0 = vld [vmem:[#allocation8 + $0xc0] sm:$0xff]  ;;  %v788_v45 = vld [vmem:[#allocation8 + $0xb8] sm:$0xff] }
 0x138   :  { %v225_v54 = vmax.f32 %v221_v6, 0.0  ;;  %722 = vmatpush.msrb.mxu2 %v704_v50  ;;  %v787_v47 = vld [vmem:[#allocation8 + $0xb0] sm:$0xff] }
 0x139   :  { %616 = vmatpush.msrb.mxu3 %v573_v48  ;;  %679 = vmatpush.msrb.mxu1 %v639_v49  ;;  %v768_v48 = vld [vmem:[#allocation8 + $0x18] sm:$0xff]  ;;  %v786_v49 = vld [vmem:[#allocation8 + $0xa8] sm:$0xff]  ;;  %v767_v50 = vld [vmem:[#allocation8 + $0x10] sm:$0xff] }
 0x13a   :  { %v492_v58 = vrot.slane %v225_v54, 1  ;;  %723 = vmatpush.msrb.mxu2 %v702_v55  ;;  %v765_v55 = vld [vmem:[#allocation8] sm:$0xff] }
 0x13b   :  { %617 = vmatpush.msrb.mxu3 %v571_v51  ;;  %680 = vmatpush.msrb.mxu1 %v637_v52  ;;  %v785_v51 = vld [vmem:[#allocation8 + $0xa0] sm:$0xff]  ;;  %v766_v52 = vld [vmem:[#allocation8 + $0x8] sm:$0xff] }
 0x13c   :  { %v496_v61 = vmax.f32 %v225_v54, %v492_v58  ;;  %724 = vmatpush.msrb.mxu2 %v700_v59  ;;  %v784_v54 = vld [vmem:[#allocation8 + $0x98] sm:$0xff]  ;;  %v782_v58 = vld [vmem:[#allocation8 + $0x88] sm:$0xff] }
 0x13d   :  { %618 = vmatpush.msrb.mxu3 %v569_v56  ;;  %681 = vmatpush.msrb.mxu1 %v635_v57  ;;  %v783_v56 = vld [vmem:[#allocation8 + $0x90] sm:$0xff] }
 0x13e   :  { %v518_v3 = vsel %vm273_vm2, %v517_v62, %v496_v61  ;;  %v580_v5 = vrot.slane %v496_v61, 2  ;;  %725 = vmatpush.msrb.mxu2 %v698_v1  ;;  %v644_v15 = vrot.slane %v496_v61, 4  ;;  %v708_v19 = vrot.slane %v496_v61, 6  ;;  %v857_v61 = vld [vmem:[#allocation10 + $0x78] sm:$0xff]  ;;  %v856_v62 = vld [vmem:[#allocation10 + $0x70] sm:$0xff]  ;;  %v855_v1 = vld [vmem:[#allocation10 + $0x68] sm:$0xff] }
 0x13f   :  { %619 = vmatpush.msrb.mxu3 %v567_v16  ;;  %682 = vmatpush.msrb.mxu1 %v633_v60  ;;  %v781_v16 = vld [vmem:[#allocation8 + $0x80] sm:$0xff] }
 0x140   :  { %910 = vmatmul.msk.f32.vlgmr.msrb.gmra.mxu0 %vm275_vm3, %v518_v3  ;;  %911 = vmatmul.msk.f32.vlgmr.msra.gmra.mxu1 %vm275_vm3, %v518_v3  ;;  %v582_v9 = vsel %vm273_vm2, %v581_v7, %v580_v5  ;;  %v646_v21 = vsel %vm273_vm2, %v645_v18, %v644_v15  ;;  %v710_v24 = vsel %vm273_vm2, %v709_v23, %v708_v19  ;;  %v851_v15 = vld [vmem:[#allocation10 + $0x48] sm:$0xff]  ;;  %v850_v18 = vld [vmem:[#allocation10 + $0x40] sm:$0xff]  ;;  %v849_v23 = vld [vmem:[#allocation10 + $0x38] sm:$0xff] }
 0x141   :  { %620 = vmatpush.msrb.mxu3 %v565_v63  ;;  %912 = vmatmul.msk.f32.vlgmr.msra.gmra.mxu2 %vm275_vm3, %v582_v9 }
 0x142   :  { %913 = vmatmul.msk.f32.vlgmr.msrb.gmra.mxu3 %vm275_vm3, %v582_v9  ;;  %683 = vmatpush.msrb.mxu1 %v631_v8  ;;  %v853_v8 = vld [vmem:[#allocation10 + $0x58] sm:$0xff] }
 0x143   :  { %741 = vmatpush.msra.mxu3 %v707_v4  ;;  %726 = vmatpush.msrb.mxu2 %v696_v11  ;;  %v854_v4 = vld [vmem:[#allocation10 + $0x60] sm:$0xff] }
 0x144   :  { %684 = vmatpush.msrb.mxu1 %v629_v12  ;;  %801 = vmatpush.msrb.mxu0 %v780_v29 }
 0x145   :  { %742 = vmatpush.msra.mxu3 %v705_v10  ;;  %727 = vmatpush.msrb.mxu2 %v694_v14  ;;  %v852_v10 = vld [vmem:[#allocation10 + $0x50] sm:$0xff] }
 0x146   :  { %802 = vmatpush.msrb.mxu0 %v779_v30  ;;  %821 = vmatpush.msra.mxu1 %v796_v32 }
 0x147   :  { %743 = vmatpush.msra.mxu3 %v703_v13  ;;  %728 = vmatpush.msrb.mxu2 %v692_v20 }
 0x148   :  { %914 = vmatmul.msk.f32.vlgmr.msra.gmra.mxu0 %vm275_vm3, %v646_v21  ;;  %915 = vmatmul.msk.f32.vlgmr.msrb.gmra.mxu1 %vm275_vm3, %v646_v21 }
 0x149   :  { %744 = vmatpush.msra.mxu3 %v701_v17  ;;  %916 = vmatmul.msk.f32.vlgmr.msrb.gmra.mxu2 %vm275_vm3, %v710_v24 }
 0x14a   :  { %803 = vmatpush.msrb.mxu0 %v778_v31  ;;  %822 = vmatpush.msra.mxu1 %v795_v33  ;;  %v847_v33 = vld [vmem:[#allocation10 + $0x28] sm:$0xff] }
 0x14b   :  { %745 = vmatpush.msra.mxu3 %v699_v22  ;;  %862 = vmatpush.msra.mxu2 %v857_v61  ;;  %v755_v22 = vld [vmem:[%s1244_s4] sm:$0x3] }
 0x14c   :  { %804 = vmatpush.msrb.mxu0 %v777_v34  ;;  %823 = vmatpush.msra.mxu1 %v794_v36  ;;  %v757_v30 = vperm.slane %v755_v22, 0 }
 0x14d   :  { %746 = vmatpush.msra.mxu3 %v697_v25  ;;  %863 = vmatpush.msra.mxu2 %v856_v62 }
 0x14e   :  { %805 = vmatpush.msrb.mxu0 %v776_v35  ;;  %824 = vmatpush.msra.mxu1 %v793_v38 }
 0x14f   :  { %747 = vmatpush.msra.mxu3 %v695_v27  ;;  %864 = vmatpush.msra.mxu2 %v855_v1  ;;  %v848_v27 = vld [vmem:[#allocation10 + $0x30] sm:$0xff] }
 0x150   :  { %806 = vmatpush.msrb.mxu0 %v775_v37  ;;  %825 = vmatpush.msra.mxu1 %v792_v2  ;;  %v758_v2 = vperm.slane %v755_v22, 1 }
 0x151   :  { %748 = vmatpush.msra.mxu3 %v693_v28  ;;  %865 = vmatpush.msra.mxu2 %v854_v4 }
 0x152   :  { %917 = vmatmul.msk.f32.vlgmr.msra.gmra.mxu3 %vm275_vm3, %v710_v24  ;;  %807 = vmatpush.msrb.mxu0 %v774_v39 }
 0x153   :  { %826 = vmatpush.msra.mxu1 %v791_v41  ;;  %866 = vmatpush.msra.mxu2 %v853_v8 }
 0x154   :  { %808 = vmatpush.msrb.mxu0 %v773_v40 }
 0x155   :  { %827 = vmatpush.msra.mxu1 %v790_v43  ;;  %867 = vmatpush.msra.mxu2 %v852_v10 }
 0x156   :  { %809 = vmatpush.msrb.mxu0 %v772_v42 }
 0x157   :  { %828 = vmatpush.msra.mxu1 %v789_v0  ;;  %868 = vmatpush.msra.mxu2 %v851_v15  ;;  %v845_v0 = vld [vmem:[#allocation10 + $0x18] sm:$0xff] }
 0x158   :  { %810 = vmatpush.msrb.mxu0 %v771_v44  ;;  %v846_v44 = vld [vmem:[#allocation10 + $0x20] sm:$0xff] }
 0x159   :  { %829 = vmatpush.msra.mxu1 %v788_v45  ;;  %869 = vmatpush.msra.mxu2 %v850_v18  ;;  %v843_v45 = vld [vmem:[#allocation10 + $0x8] sm:$0xff] }
 0x15a   :  { %811 = vmatpush.msrb.mxu0 %v770_v26  ;;  %v844_v26 = vld [vmem:[#allocation10 + $0x10] sm:$0xff] }
 0x15b   :  { %830 = vmatpush.msra.mxu1 %v787_v47  ;;  %870 = vmatpush.msra.mxu2 %v849_v23  ;;  %v941_v47 = vld [vmem:[%s1246_s6] ss:$0 sm:$0xff] }
 0x15c   :  { %812 = vmatpush.msrb.mxu0 %v769_v46  ;;  %v842_v46 = vld [vmem:[#allocation10] sm:$0xff] }
 0x15d   :  { %831 = vmatpush.msra.mxu1 %v786_v49  ;;  %871 = vmatpush.msra.mxu2 %v848_v27 }
 0x15e   :  { %813 = vmatpush.msrb.mxu0 %v768_v48 }
 0x15f   :  { %832 = vmatpush.msra.mxu1 %v785_v51  ;;  %872 = vmatpush.msra.mxu2 %v847_v33 }
 0x160   :  { %814 = vmatpush.msrb.mxu0 %v767_v50 }
 0x161   :  { %833 = vmatpush.msra.mxu1 %v784_v54  ;;  %873 = vmatpush.msra.mxu2 %v846_v44 }
 0x162   :  { %815 = vmatpush.msrb.mxu0 %v766_v52  ;;  %v942_v52 = vld [vmem:[%s1248_s8] ss:$0 sm:$0xff] }
 0x163   :  { %834 = vmatpush.msra.mxu1 %v783_v56  ;;  %874 = vmatpush.msra.mxu2 %v845_v0 }
 0x164   :  { %816 = vmatpush.msrb.mxu0 %v765_v55 }
 0x165   :  { %835 = vmatpush.msra.mxu1 %v782_v58  ;;  %875 = vmatpush.msra.mxu2 %v844_v26 }
 0x167   :  { %836 = vmatpush.msra.mxu1 %v781_v16  ;;  %876 = vmatpush.msra.mxu2 %v843_v45 }
 0x169   :  { %877 = vmatpush.msra.mxu2 %v842_v46 }
 0x19e   :  { %v315_v57 = vpop.f32.mrf.mxu1 }
 0x19f   :  { %v401_v59 = vpop.f32.mrf.mxu0 }
 0x1a4   :  { %v295_v6 = vpop.f32.mrf.mxu3 }
 0x1a5   :  { %v339_v53 = vpop.f32.mrf.mxu2 }
 0x1a6   :  { %v340_v3 = vadd.f32 %v339_v53, %v295_v6  ;;  %v421_v5 = vpop.f32.mrf.mxu1 }
 0x1a8   :  { %v424_v9 = vadd.f32 %v401_v59, %v340_v3 }
 0x1ad   :  { %v359_v60 = vpop.f32.mrf.mxu3  ;;  %v465_v63 = vpop.f32.mrf.mxu2 }
 0x1ae   :  { %v488_v11 = vadd.f32 %v465_v63, %v424_v9  ;;  %v360_v13 = vadd.f32 %v359_v60, %v315_v57 }
 0x1b0   :  { %v425_v21 = vadd.f32 %v421_v5, %v360_v13 }
 0x1b5   :  { %v485_v12 = vpop.f32.mrf.mxu3 }
 0x1b6   :  { %v489_v24 = vadd.f32 %v485_v12, %v425_v21 }
 0x1bd   :  { %v538_v7 = vpop.f32.mrf.mxu0  ;;  %v558_v19 = vpop.f32.mrf.mxu1 }
 0x1be   :  { %v561_v17 = vadd.f32 %v538_v7, %v488_v11  ;;  %v562_v31 = vadd.f32 %v558_v19, %v489_v24 }
 0x1c4   :  { %v602_v14 = vpop.f32.mrf.mxu2 }
 0x1c5   :  { %v625_v20 = vadd.f32 %v602_v14, %v561_v17  ;;  %v666_v25 = vpop.f32.mrf.mxu0  ;;  %v622_v28 = vpop.f32.mrf.mxu3 }
 0x1c6   :  { %v626_v35 = vadd.f32 %v622_v28, %v562_v31  ;;  %v686_v37 = vpop.f32.mrf.mxu1 }
 0x1c7   :  { %v689_v29 = vadd.f32 %v666_v25, %v625_v20 }
 0x1c8   :  { %v690_v39 = vadd.f32 %v686_v37, %v626_v35 }
 0x1cc   :  { %v730_v32 = vpop.f32.mrf.mxu2 }
 0x1cd   :  { %v753_v34 = vadd.f32 %v730_v32, %v689_v29 }
 0x1cf   :  { %v761_v36 = vadd.f32 %v757_v30, %v753_v34 }
 0x1d1   :  { %v763_v38 = vmax.f32 %v761_v36, 0.0 }
 0x1d3   :  { %817 = vmatmul.f32.vlgmr.msrb.gmra.mxu0 %v763_v38 }
 0x1d5   :  { %v750_v40 = vpop.f32.mrf.mxu3 }
 0x1d6   :  { %v754_v41 = vadd.f32 %v750_v40, %v690_v39 }
 0x1d8   :  { %v762_v42 = vadd.f32 %v758_v2, %v754_v41 }
 0x1da   :  { %v764_v43 = vmax.f32 %v762_v42, 0.0 }
 0x1dc   :  { %837 = vmatmul.f32.vlgmr.msra.gmra.mxu1 %v764_v43 }
 0x250   :  { %v818_v48 = vpop.f32.mrf.mxu0 }
 0x251   :  { %v819_v49 = vadd.f32 %v941_v47, %v818_v48 }
 0x259   :  { %v838_v6 = vpop.f32.mrf.mxu1 }
 0x25a   :  { %v839_v50 = vadd.f32 %v838_v6, %v819_v49 }
 0x25c   :  { %v841_v51 = vmax.f32 %v839_v50, 0.0 }
 0x25e   :  { %878 = vmatmul.f32.vlgmr.msra.gmra.mxu2 %v841_v51 }
 0x2e1   :  { %v879_v53 = vpop.f32.mrf.mxu2 }
 0x2e2   :  { %v880_v54 = vadd.f32 %v942_v52, %v879_v53 }
 0x2e4   :  { %882 = vst [vmem:[#allocation11] sm:$0x3] %v880_v54 }
 0x2e5   :  { %893 = dma.vmem_to_hbm [thread:$0]  %s889_s20, 32, %s891_s1, [#allocation4]  }
 0x2e6   :  { %1093 = dma.done.wait [#allocation4], 32  }
 0x2e7   :  { %1094 = vsyncadd [#allocation4], 4294967264 }
 0x2e8   :  { %898 = vsyncpa [#allocation3], 1 }
 0x2e9   :  { %899 = vsyncpa [#allocation6], 1 }
 0x2ea   :  { %900 = vsyncpa [#allocation9], 1 }
 0x2eb   :  { %901 = vsyncpa [#allocation4], 1 }

</bundles_post_ra>
